<compile_context>
chip_gen: v5e
topology: v5e:2x2
jax: 0.10.0
libtpu: 0.0.40
codegen_flags: <defaults>
</compile_context>

<pallas_src>
import jax
import jax.numpy as jnp
import numpy as np
from jax.experimental import pallas as pl
from jax.experimental.pallas import tpu as pltpu

# ---- synthetic config (mirrors config.*) ------------------------------------
ENCODE_LAYER = 8          # sequence length (conv "height")
FILTER_SIZES = (2, 3, 4)  # conv kernel heights
HIDDEN_SIZE = 32          # conv "width" (full-width kernels)
N_CLASS = 3
NUM_FILTERS = 4
NUM_FILTER_TOTAL = NUM_FILTERS * len(FILTER_SIZES)


def _round_up(a, b):
    return (a + b - 1) // b * b


# ---- derived static layout constants ----------------------------------------
S_MAX = max(FILTER_SIZES)                                   # 4
T_PAD = _round_up(ENCODE_LAYER - min(FILTER_SIZES) + 1, 8)  # 8 padded time rows
K_CONV = S_MAX * HIDDEN_SIZE                                # 128 (im2col depth)
N_PAD = _round_up(max(NUM_FILTER_TOTAL, N_CLASS), 128)      # 128 lane-dense
AUX_ROWS = 16 + T_PAD                                       # 24
assert T_PAD == ENCODE_LAYER        # shifted-slice construction assumes this
assert K_CONV % 32 == 0


# ---- Pallas kernel -----------------------------------------------------------
def _textcnn_kernel(x_ref, w_ref, aux_ref, out_ref):
    """Fused conv (4 shifted K=32 MXU pushes) + bias + ReLU + time-mask +
    max-pool + linear head.

    x_ref   : [TB, 8, 32]  f32 activations (full L,H extent; batch-tiled)
    w_ref   : [256, 128]   bf16; rows 0:128 conv weights (row d*32+c, col =
                           filter), rows 128:256 linear-head weights
    aux_ref : [24, 128]    f32; row 0 conv bias, row 8 linear bias,
                           rows 16:24 per-filter time-validity {0,1} mask
    out_ref : [TB, 128]    bf16 lane-dense logits (cols >= n_class are 0)
    """
    tb = x_ref.shape[0]
    xb = x_ref[...].astype(jnp.bfloat16)                        # [TB, 8, 32]

    b_conv = aux_ref[0:1, :]                                    # [1, 128]
    b_lin = aux_ref[8:9, :]                                     # [1, 128]
    mask = aux_ref[16:16 + T_PAD, :]                            # [8, 128]

    # All convolutions at once: h[:, t, :] = sum_d x[:, t+d, :] @ W_d.
    # The shifted LHS rows past the end of the sequence are explicit zeros;
    # their contributions are also killed by zero weight rows / the mask.
    h = None
    for d in range(S_MAX):
        if d == 0:
            xd = xb
        else:
            xd = jnp.concatenate(
                [xb[:, d:, :],
                 jnp.zeros((tb, d, HIDDEN_SIZE), jnp.bfloat16)], axis=1)
        w_d = w_ref[d * HIDDEN_SIZE:(d + 1) * HIDDEN_SIZE, :]   # [32, 128]
        g = jax.lax.dot_general(
            xd, w_d, (((2,), (0,)), ((), ())),
            preferred_element_type=jnp.float32)                 # [TB, 8, 128]
        h = g if h is None else h + g

    # Bias + ReLU, then zero filter-size-invalid time rows (post-ReLU values
    # are >= 0, so the max over time is unaffected).
    h = jnp.maximum(h + b_conv, 0.0) * mask
    pooled = jnp.max(h, axis=1)                                 # [TB, 128] f32

    w_lin = w_ref[K_CONV:K_CONV + N_PAD, :]                     # [128, 128]
    logits = jnp.dot(pooled.astype(jnp.bfloat16), w_lin,
                     preferred_element_type=jnp.float32) + b_lin
    out_ref[...] = logits.astype(out_ref.dtype)


# ---- host-side parameter packing --------------------------------------------
def _pack_params(conv_ws, conv_bs, lin_w, lin_b):
    """Pack parameters into one bf16 weight slab and one f32 aux slab.

    conv_ws[i]: [s_i, H, F]   (PyTorch Conv2d weight [F,1,s_i,H] transposed)
    conv_bs[i]: [F]
    lin_w     : [num_filter_total, n_class]  (PyTorch Linear.weight.T)
    lin_b     : [n_class]
    """
    F = NUM_FILTERS
    w_conv = np.zeros((K_CONV, N_PAD), np.float32)
    b_conv = np.zeros((N_PAD,), np.float32)
    mask = np.zeros((T_PAD, N_PAD), np.float32)
    for i, s in enumerate(FILTER_SIZES):
        w_i = np.asarray(conv_ws[i], np.float32).reshape(s * HIDDEN_SIZE, F)
        w_conv[:s * HIDDEN_SIZE, i * F:(i + 1) * F] = w_i
        b_conv[i * F:(i + 1) * F] = np.asarray(conv_bs[i], np.float32).reshape(F)
        t_i = ENCODE_LAYER - s + 1
        mask[:t_i, i * F:(i + 1) * F] = 1.0      # rows >= t_i (incl. row 7) stay 0

    w_lin = np.zeros((N_PAD, N_PAD), np.float32)
    w_lin[:NUM_FILTER_TOTAL, :N_CLASS] = np.asarray(lin_w, np.float32)
    b_lin_p = np.zeros((N_PAD,), np.float32)
    b_lin_p[:N_CLASS] = np.asarray(lin_b, np.float32).reshape(-1)

    w_slab = jnp.asarray(np.concatenate([w_conv, w_lin], axis=0),
                         dtype=jnp.bfloat16)                     # [256, 128]
    aux = np.zeros((AUX_ROWS, N_PAD), np.float32)
    aux[0, :] = b_conv
    aux[8, :] = b_lin_p
    aux[16:16 + T_PAD, :] = mask                                 # [24, 128]
    return w_slab, jnp.asarray(aux)


# ---- wrapper -----------------------------------------------------------------
def _choose_tb(B, block_b):
    """Batch tile: multiple of 8, <= block_b, <= B, ragged-tail waste <=~12.5%."""
    base = max(8, (B // 8) * 8)                  # largest multiple of 8 <= B
    tb = max(8, min(_round_up(block_b, 8), base))
    while tb > 64:
        tail = (-B) % tb                         # dead rows in the last block
        if tail * 8 <= B:
            break
        tb = max(64, (tb // 2) // 8 * 8)
    return tb


def textcnn_forward(x, conv_ws, conv_bs, lin_w, lin_b, *, block_b=1024):
    """x: [B, L, H] -> logits [B, n_class] float32."""
    B, L, H = x.shape
    assert L == ENCODE_LAYER and H == HIDDEN_SIZE

    w_slab, aux_slab = _pack_params(conv_ws, conv_bs, lin_w, lin_b)
    if x.dtype != jnp.float32:
        x = x.astype(jnp.float32)

    # Only sub-8 batches get a (tiny) pad; otherwise the grid is ragged over
    # batch and no HBM-side copy of x is ever made.
    if B < 8:
        x_in = jnp.pad(x, ((0, 8 - B), (0, 0), (0, 0)))
        b_eff = 8
    else:
        x_in = x
        b_eff = B

    TB = _choose_tb(b_eff, block_b)
    nb = (b_eff + TB - 1) // TB

    out = pl.pallas_call(
        _textcnn_kernel,
        out_shape=jax.ShapeDtypeStruct((b_eff, N_PAD), jnp.bfloat16),
        grid=(nb,),
        in_specs=[
            pl.BlockSpec((TB, ENCODE_LAYER, HIDDEN_SIZE), lambda b: (b, 0, 0)),
            pl.BlockSpec((K_CONV + N_PAD, N_PAD), lambda b: (0, 0)),
            pl.BlockSpec((AUX_ROWS, N_PAD), lambda b: (0, 0)),
        ],
        out_specs=pl.BlockSpec((TB, N_PAD), lambda b: (b, 0)),
        compiler_params=pltpu.CompilerParams(
            dimension_semantics=("parallel",),
            vmem_limit_bytes=32 * 1024 * 1024),
    )(x_in, w_slab, aux_slab)

    return out[:B, :N_CLASS].astype(jnp.float32)


# ---- pure-JAX reference (same math, for a correctness check) -----------------
def reference(x, conv_ws, conv_bs, lin_w, lin_b):
    pooled = []
    for i, s in enumerate(FILTER_SIZES):
        T = ENCODE_LAYER - s + 1
        acc = jnp.zeros((x.shape[0], T, NUM_FILTERS), jnp.float32)
        for d in range(s):
            acc = acc + jnp.einsum('bth,hf->btf', x[:, d:d + T, :], conv_ws[i][d])
        h = jnp.maximum(acc + conv_bs[i], 0.0)
        pooled.append(jnp.max(h, axis=1))
    h_pool = jnp.concatenate(pooled, axis=1)
    return h_pool @ lin_w + lin_b


if __name__ == "__main__":
    B = 2
    key = jax.random.PRNGKey(0)
    keys = jax.random.split(key, 2 + 2 * len(FILTER_SIZES))

    # input activations [B, encode_layer, hidden_size]
    x = jax.random.normal(keys[0], (B, ENCODE_LAYER, HIDDEN_SIZE), jnp.float32)

    # deterministic parameter init (synthetic, shapes from the module __init__)
    conv_ws, conv_bs = [], []
    for i, s in enumerate(FILTER_SIZES):
        conv_ws.append(0.1 * jax.random.normal(
            keys[1 + i], (s, HIDDEN_SIZE, NUM_FILTERS), jnp.float32))
        conv_bs.append(0.1 * jax.random.normal(
            keys[1 + len(FILTER_SIZES) + i], (NUM_FILTERS,), jnp.float32))
    lin_w = 0.1 * jax.random.normal(
        keys[-1], (NUM_FILTER_TOTAL, N_CLASS), jnp.float32)   # Linear.weight.T
    lin_b = jnp.ones((N_CLASS,), jnp.float32)                 # torch.ones([n_class])

    out = textcnn_forward(x, conv_ws, conv_bs, lin_w, lin_b)
    out = jax.block_until_ready(out)

    ref = reference(x, conv_ws, conv_bs, lin_w, lin_b)
    # bf16 matmul operands + bf16 output write -> loosened tolerance.
    np.testing.assert_allclose(np.asarray(out, np.float32),
                               np.asarray(ref, np.float32),
                               rtol=5e-2, atol=5e-2)
    assert out.shape == (B, N_CLASS)
    print("KERNEL_OK")
</pallas_src>

<mosaic_0001>
module attributes {stable_mosaic.version = 11 : i64} {
  func.func @_textcnn_kernel(%arg0: i32, %arg1: memref<8x8x32xf32, #tpu.memory_space<vmem>>, %arg2: memref<256x128xbf16, #tpu.memory_space<vmem>>, %arg3: memref<24x128xf32, #tpu.memory_space<vmem>>, %arg4: memref<8x128xbf16, #tpu.memory_space<vmem>>) attributes {dimension_semantics = [#tpu.dimension_semantics<parallel>], iteration_bounds = array<i64: 1>, scalar_prefetch = 0 : i64, scratch_operands = 0 : i64, tpu.core_type = #tpu.core_type<tc>, window_params = [{transform_indices = @transform_0, window_bounds = array<i64: 8, 8, 32>}, {pipeline_mode = #tpu.pipeline_mode<synchronous>, transform_indices = @transform_1, window_bounds = array<i64: 256, 128>}, {pipeline_mode = #tpu.pipeline_mode<synchronous>, transform_indices = @transform_2, window_bounds = array<i64: 24, 128>}, {transform_indices = @transform_3, window_bounds = array<i64: 8, 128>}]} {
    %c0 = arith.constant 0 : index
    %c0_0 = arith.constant 0 : index
    %c0_1 = arith.constant 0 : index
    %0 = vector.load %arg1[%c0, %c0_0, %c0_1] : memref<8x8x32xf32, #tpu.memory_space<vmem>>, vector<8x8x32xf32>
    %1 = arith.truncf %0 : vector<8x8x32xf32> to vector<8x8x32xbf16>
    %c0_2 = arith.constant 0 : index
    %c0_3 = arith.constant 0 : index
    %2 = vector.load %arg3[%c0_2, %c0_3] : memref<24x128xf32, #tpu.memory_space<vmem>>, vector<1x128xf32>
    %c8 = arith.constant 8 : index
    %c0_4 = arith.constant 0 : index
    %3 = vector.load %arg3[%c8, %c0_4] : memref<24x128xf32, #tpu.memory_space<vmem>>, vector<1x128xf32>
    %c16 = arith.constant 16 : index
    %c0_5 = arith.constant 0 : index
    %4 = vector.load %arg3[%c16, %c0_5] : memref<24x128xf32, #tpu.memory_space<vmem>>, vector<8x128xf32>
    %c0_6 = arith.constant 0 : index
    %c0_7 = arith.constant 0 : index
    %5 = vector.load %arg2[%c0_6, %c0_7] : memref<256x128xbf16, #tpu.memory_space<vmem>>, vector<32x128xbf16>
    %cst = arith.constant dense<0.000000e+00> : vector<8x8x128xf32>
    %6 = tpu.matmul %1, %5, %cst {dimension_numbers = #tpu.dot_dimension_numbers<[2], [0], [0, 1], [1], [0, 0, 0, 1, 1, 1], [], []>} : vector<8x8x32xbf16>, vector<32x128xbf16>, vector<8x8x128xf32> -> vector<8x8x128xf32>
    %7 = vector.extract_strided_slice %1 {offsets = [0, 1, 0], sizes = [8, 7, 32], strides = [1, 1, 1]} : vector<8x8x32xbf16> to vector<8x7x32xbf16>
    %cst_8 = arith.constant 0.000000e+00 : bf16
    %8 = vector.broadcast %cst_8 : bf16 to vector<8x1x32xbf16>
    %9 = tpu.concatenate %7, %8 in 1 : vector<8x7x32xbf16>, vector<8x1x32xbf16> -> vector<8x8x32xbf16>
    %c32 = arith.constant 32 : index
    %c0_9 = arith.constant 0 : index
    %10 = vector.load %arg2[%c32, %c0_9] : memref<256x128xbf16, #tpu.memory_space<vmem>>, vector<32x128xbf16>
    %cst_10 = arith.constant dense<0.000000e+00> : vector<8x8x128xf32>
    %11 = tpu.matmul %9, %10, %cst_10 {dimension_numbers = #tpu.dot_dimension_numbers<[2], [0], [0, 1], [1], [0, 0, 0, 1, 1, 1], [], []>} : vector<8x8x32xbf16>, vector<32x128xbf16>, vector<8x8x128xf32> -> vector<8x8x128xf32>
    %12 = arith.addf %6, %11 : vector<8x8x128xf32>
    %13 = vector.extract_strided_slice %1 {offsets = [0, 2, 0], sizes = [8, 6, 32], strides = [1, 1, 1]} : vector<8x8x32xbf16> to vector<8x6x32xbf16>
    %cst_11 = arith.constant 0.000000e+00 : bf16
    %14 = vector.broadcast %cst_11 : bf16 to vector<8x2x32xbf16>
    %15 = tpu.concatenate %13, %14 in 1 : vector<8x6x32xbf16>, vector<8x2x32xbf16> -> vector<8x8x32xbf16>
    %c64 = arith.constant 64 : index
    %c0_12 = arith.constant 0 : index
    %16 = vector.load %arg2[%c64, %c0_12] : memref<256x128xbf16, #tpu.memory_space<vmem>>, vector<32x128xbf16>
    %cst_13 = arith.constant dense<0.000000e+00> : vector<8x8x128xf32>
    %17 = tpu.matmul %15, %16, %cst_13 {dimension_numbers = #tpu.dot_dimension_numbers<[2], [0], [0, 1], [1], [0, 0, 0, 1, 1, 1], [], []>} : vector<8x8x32xbf16>, vector<32x128xbf16>, vector<8x8x128xf32> -> vector<8x8x128xf32>
    %18 = arith.addf %12, %17 : vector<8x8x128xf32>
    %19 = vector.extract_strided_slice %1 {offsets = [0, 3, 0], sizes = [8, 5, 32], strides = [1, 1, 1]} : vector<8x8x32xbf16> to vector<8x5x32xbf16>
    %cst_14 = arith.constant 0.000000e+00 : bf16
    %20 = vector.broadcast %cst_14 : bf16 to vector<8x3x32xbf16>
    %21 = tpu.concatenate %19, %20 in 1 : vector<8x5x32xbf16>, vector<8x3x32xbf16> -> vector<8x8x32xbf16>
    %c96 = arith.constant 96 : index
    %c0_15 = arith.constant 0 : index
    %22 = vector.load %arg2[%c96, %c0_15] : memref<256x128xbf16, #tpu.memory_space<vmem>>, vector<32x128xbf16>
    %cst_16 = arith.constant dense<0.000000e+00> : vector<8x8x128xf32>
    %23 = tpu.matmul %21, %22, %cst_16 {dimension_numbers = #tpu.dot_dimension_numbers<[2], [0], [0, 1], [1], [0, 0, 0, 1, 1, 1], [], []>} : vector<8x8x32xbf16>, vector<32x128xbf16>, vector<8x8x128xf32> -> vector<8x8x128xf32>
    %24 = arith.addf %18, %23 : vector<8x8x128xf32>
    %25 = vector.shape_cast %2 : vector<1x128xf32> to vector<1x1x128xf32>
    %26 = vector.broadcast %25 : vector<1x1x128xf32> to vector<8x8x128xf32>
    %27 = arith.addf %24, %26 : vector<8x8x128xf32>
    %cst_17 = arith.constant 0.000000e+00 : f32
    %28 = vector.broadcast %cst_17 : f32 to vector<8x8x128xf32>
    %29 = arith.maximumf %27, %28 : vector<8x8x128xf32>
    %30 = vector.shape_cast %4 : vector<8x128xf32> to vector<1x8x128xf32>
    %31 = vector.broadcast %30 : vector<1x8x128xf32> to vector<8x8x128xf32>
    %32 = arith.mulf %29, %31 : vector<8x8x128xf32>
    %cst_18 = arith.constant dense<0xFF800000> : vector<8x128xf32>
    %33 = vector.multi_reduction <maximumf>, %32, %cst_18 [1] : vector<8x8x128xf32> to vector<8x128xf32>
    %c128 = arith.constant 128 : index
    %c0_19 = arith.constant 0 : index
    %34 = vector.load %arg2[%c128, %c0_19] : memref<256x128xbf16, #tpu.memory_space<vmem>>, vector<128x128xbf16>
    %35 = arith.truncf %33 : vector<8x128xf32> to vector<8x128xbf16>
    %cst_20 = arith.constant dense<0.000000e+00> : vector<8x128xf32>
    %36 = tpu.matmul %35, %34, %cst_20 {dimension_numbers = #tpu.dot_dimension_numbers<[1], [0], [0], [1], [0, 0, 1, 1], [], []>} : vector<8x128xbf16>, vector<128x128xbf16>, vector<8x128xf32> -> vector<8x128xf32>
    %37 = vector.broadcast %3 : vector<1x128xf32> to vector<8x128xf32>
    %38 = arith.addf %36, %37 : vector<8x128xf32>
    %39 = arith.truncf %38 : vector<8x128xf32> to vector<8x128xbf16>
    %c0_21 = arith.constant 0 : index
    %c0_22 = arith.constant 0 : index
    %40 = vector.load %arg4[%c0_21, %c0_22] : memref<8x128xbf16, #tpu.memory_space<vmem>>, vector<8x128xbf16>
    tpu.vector_store %arg4[%c0_21, %c0_22], %39 {strides = array<i32>} : memref<8x128xbf16, #tpu.memory_space<vmem>>, vector<8x128xbf16>,
    return
  }
  func.func @transform_0(%arg0: i32) -> (i32, i32, i32) {
    %c0_i32 = arith.constant 0 : i32
    %c0_i32_0 = arith.constant 0 : i32
    %c0_i32_1 = arith.constant 0 : i32
    return %arg0, %c0_i32, %c0_i32_0 : i32, i32, i32
  }
  func.func @transform_1(%arg0: i32) -> (i32, i32) {
    %c0_i32 = arith.constant 0 : i32
    %c0_i32_0 = arith.constant 0 : i32
    %c0_i32_1 = arith.constant 0 : i32
    return %c0_i32, %c0_i32_0 : i32, i32
  }
  func.func @transform_2(%arg0: i32) -> (i32, i32) {
    %c0_i32 = arith.constant 0 : i32
    %c0_i32_0 = arith.constant 0 : i32
    %c0_i32_1 = arith.constant 0 : i32
    return %c0_i32, %c0_i32_0 : i32, i32
  }
  func.func @transform_3(%arg0: i32) -> (i32, i32) {
    %c0_i32 = arith.constant 0 : i32
    %c0_i32_0 = arith.constant 0 : i32
    return %arg0, %c0_i32 : i32, i32
  }
}

</mosaic_0001>

<bundles_post_ra>
// kernel: tpu_custom_call.1
= control target key start
LH: loop header
LB: loop body
LE: loop exit
PB: predicated region body
PF: predicated region fallthrough
CT: control target
= control target key end

     0   :  { %8 = vsyncpa [#allocation3], 0  ;;  %s1121_s0 = inlined_call_operand.hbm [shape: f32[8,8,32], index: 0, kind: input, shape index: {}]   ;;  %s1122_s1 = inlined_call_operand.hbm [shape: bf16[256,128], index: 1, kind: input, shape index: {}]   ;;  %s1123_s2 = inlined_call_operand.hbm [shape: f32[24,128], index: 2, kind: input, shape index: {}]   ;;  %s1124_s3 = inlined_call_operand.hbm [shape: bf16[8,128], index: 3, kind: output, shape index: {}]  }
   0x1   :  { %9 = vsyncpa [#allocation6], 0  ;;  %s28_s14 = sshll.u32 %s1122_s1, 4  ;;  %s29_s14 = int_to_ptr.hbm [resolvable:$true] %s28_s14 }
   0x2   :  { %10 = vsyncpa [#allocation4], 0  ;;  %s978_s15 = smov [#allocation5]   ;;  %s15_s19 = sshll.u32 %s1121_s0, 4  ;;  %s16_s19 = int_to_ptr.hbm [resolvable:$true] %s15_s19 }
   0x3   :  { %s30_s16 = sshll.u32 %s978_s15, 4  ;;  %s979_s20 = smov 64   ;;  %s31_s16 = int_to_ptr.vmem [resolvable:$true] %s30_s16 }
   0x4   :  { %s980_s21 = smov 4   ;;  %s981_s22 = smov [#allocation2]  }
   0x5   :  { %36 = dma.hbm_to_vmem [thread:$0]  %s29_s14, 2048, %s31_s16, [#allocation6], %s979_s20, %s979_s20, %s980_s21  }
   0x6   :  { %s17_s23 = sshll.u32 %s981_s22, 4  ;;  %s982_s24 = smov 128   ;;  %s18_s23 = int_to_ptr.vmem [resolvable:$true] %s17_s23 }
   0x7   :  { %s983_s25 = smov 8   ;;  %s41_s27 = sshll.u32 %s1123_s2, 4  ;;  %s42_s27 = int_to_ptr.hbm [resolvable:$true] %s41_s27 }
   0x8   :  { %23 = dma.hbm_to_vmem [thread:$0]  %s16_s19, 1024, %s18_s23, [#allocation3], %s982_s24, %s982_s24, %s983_s25  }
   0x9   :  { %s984_s28 = smov [#allocation7]  }
   0xa   :  { %s43_s29 = sshll.u32 %s984_s28, 4  ;;  %s44_s29 = int_to_ptr.vmem [resolvable:$true] %s43_s29 }
   0xb   :  { %49 = dma.hbm_to_vmem [thread:$0]  %s42_s27, 384, %s44_s29, [#allocation6], %s982_s24, %s982_s24, %s983_s25  }
   0xc   :  { %972 = dma.done.wait [#allocation3], 1024  }
   0xd   :  { %973 = vsyncadd [#allocation3], 4294966272 }
   0xe   :  { %974 = dma.done.wait [#allocation6], 2432  }
   0xf   :  { %975 = vsyncadd [#allocation6], 4294964864  ;;  %v851_v0 = vld [vmem:[#allocation5 + $0x8] sm:$0xff]  ;;  %v850_v2 = vld [vmem:[#allocation5] sm:$0xff]  ;;  %vm221_vm0 = vcmask 261120   ;;  %vm328_vm1 = vcmask 1042432  }
  0x10   :  { %v855_v1 = vld [vmem:[#allocation5 + $0x28] sm:$0xff]  ;;  %v853_v3 = vld [vmem:[#allocation5 + $0x18] sm:$0xff]  ;;  %v854_v4 = vld [vmem:[#allocation5 + $0x20] sm:$0xff]  ;;  %297 = vmatpush.bf16.msra.mxu1 %v851_v0  ;;  %vm174_vm2 = vcmask 1043456   ;;  %vm175_vm3 = vsmask.f32 3328 }
  0x11   :  { %v857_v5 = vld [vmem:[#allocation5 + $0x38] sm:$0xff]  ;;  %400 = vmatpush.bf16.msra.mxu2 %v855_v1  ;;  %v63_v6 = vld [vmem:[#allocation2] sm:$0xff]  ;;  %v64_v7 = vld [vmem:[#allocation2 + $0x8] sm:$0xff]  ;;  %240 = vmatpush.bf16.msra.mxu0 %v853_v3  ;;  %vm464_vm4 = vsmask.f32 2304  ;;  %vm673_vm7 = vcmask 1041409  }
  0x12   :  { %v852_v8 = vld [vmem:[#allocation5 + $0x10] sm:$0xff]  ;;  %528 = vmatpush.bf16.msra.mxu3 %v857_v5  ;;  %v71_v9 = vpack.c.bf16 %v63_v6, %v63_v6  ;;  %v72_v10 = vpack.c.bf16 %v64_v7, %v64_v7  ;;  %v66_v13 = vld [vmem:[#allocation2 + $0x18] sm:$0xff]  ;;  %v67_v34 = vld [vmem:[#allocation2 + $0x20] sm:$0xff]  ;;  %vm675_vm8 = vcmask 1042434   ;;  %vm677_vm9 = vcmask 1043459   ;;  %s985_s0 = smov [#allocation8]  }
  0x13   :  { %v856_v11 = vld [vmem:[#allocation5 + $0x30] sm:$0xff]  ;;  %v74_v15 = vpack.c.bf16 %v66_v13, %v66_v13  ;;  %vm1026_vm5 = vmand %vm174_vm2, %vm175_vm3  ;;  %v68_v40 = vld [vmem:[#allocation2 + $0x28] sm:$0xff]  ;;  %v75_v49 = vpack.c.bf16 %v67_v34, %v67_v34  ;;  %vm679_vm10 = vcmask 1044484   ;;  %vm681_vm11 = vcmask 1045509   ;;  %s757_s2 = sshll.u32 %s985_s0, 4  ;;  %s759_s5 = sshll.u32 %s1124_s3, 4  ;;  %s758_s2 = int_to_ptr.vmem [resolvable:$true] %s757_s2  ;;  %s760_s5 = int_to_ptr.hbm [resolvable:$true] %s759_s5 }
  0x14   :  { %v65_v12 = vld [vmem:[#allocation2 + $0x10] sm:$0xff]  ;;  %v94_v16 = vunpack.c.l.b16 %v71_v9  ;;  %v95_v17 = vunpack.c.l.b16 %v72_v10  ;;  %298 = vmatpush.bf16.msra.mxu1 %v850_v2  ;;  %vm1032_vm6 = vmand %vm328_vm1, %vm464_vm4  ;;  %v76_v53 = vpack.c.bf16 %v68_v40, %v68_v40  ;;  %vm683_vm12 = vcmask 1046534  }
  0x15   :  { %v73_v14 = vpack.c.bf16 %v65_v12, %v65_v12  ;;  %401 = vmatpush.bf16.msra.mxu2 %v854_v4  ;;  %241 = vmatpush.bf16.msra.mxu0 %v852_v8  ;;  %v1017_v22 = vunpack.c.l.b16 %v74_v15  ;;  %v1049_v5 = vunpack.c.l.b16 %v75_v49  ;;  %vm685_vm13 = vcmask 1047559  }
  0x16   :  { %v102_v19 = vpack.c.b16 %v94_v16, %v94_v16  ;;  %v103_v20 = vpack.c.b16 %v95_v17, %v95_v17  ;;  %v263_v21 = vpack.c.b16 %v95_v17, %v94_v16  ;;  %529 = vmatpush.bf16.msra.mxu3 %v856_v11  ;;  %v99_v16 = vunpack.c.l.b16 %v76_v53 }
  0x17   :  { %v1015_v18 = vunpack.c.l.b16 %v73_v14  ;;  %v105_v45 = vpack.c.b16 %v1017_v22, %v1017_v22 }
  0x18   :  { %790 = vmatmul.msk.bf16.vlgmr.msra.gmra.mxu1 %vm221_vm0, %v263_v21  ;;  %v320_v23 = vrot.slane %v102_v19, 1  ;;  %v321_v24 = vrot.slane %v103_v20, 1  ;;  %v111_v25 = vshrl.u32 %v102_v19, 16  ;;  %v113_v26 = vshll.u32 %v102_v19, 16 }
  0x19   :  { %v118_v27 = vshrl.u32 %v103_v20, 16  ;;  %v120_v28 = vshll.u32 %v103_v20, 16  ;;  %v104_v29 = vpack.c.b16 %v1015_v18, %v1015_v18  ;;  %v323_v61 = vrot.slane %v105_v45, 1 }
  0x1a   :  { %v331_v30 = vsel %vm328_vm1, %v320_v23, 0  ;;  %v333_v31 = vsel %vm328_vm1, %v321_v24, 0  ;;  %v115_v32 = vrot.slane %v113_v26, 1  ;;  %v431_v33 = vrot.slane %v111_v25, 1 }
  0x1b   :  { %v358_v35 = vunpack.c.l.b16 %v331_v30  ;;  %v359_v36 = vunpack.c.l.b16 %v333_v31  ;;  %v122_v37 = vrot.slane %v120_v28, 1  ;;  %v432_v39 = vrot.slane %v113_v26, 2 }
  0x1c   :  { %v116_v41 = vor.u32 %v115_v32, %v111_v25  ;;  %v434_v42 = vrot.slane %v118_v27, 1  ;;  %v435_v43 = vrot.slane %v120_v28, 2  ;;  %v322_v52 = vrot.slane %v104_v29, 1 }
  0x1d   :  { %v366_v46 = vpack.c.b16 %v359_v36, %v358_v35  ;;  %v123_v47 = vor.u32 %v122_v37, %v118_v27  ;;  %v433_v48 = vor.u32 %v432_v39, %v431_v33  ;;  %v125_v57 = vshrl.u32 %v104_v29, 16  ;;  %v69_v36 = vld [vmem:[#allocation2 + $0x30] sm:$0xff]  ;;  %v70_v37 = vld [vmem:[#allocation2 + $0x38] sm:$0xff] }
  0x1e   :  { %v177_v50 = vsel %vm1026_vm5, %v116_v41, 0  ;;  %v436_v51 = vor.u32 %v435_v43, %v434_v42  ;;  %v127_v63 = vshll.u32 %v104_v29, 16  ;;  %v132_v0 = vshrl.u32 %v105_v45, 16 }
  0x1f   :  { %802 = vmatmul.msk.bf16.vlgmr.msra.gmra.mxu2 %vm221_vm0, %v366_v46  ;;  %v178_v54 = vsel %vm1026_vm5, %v123_v47, 0  ;;  %v197_v55 = vunpack.c.l.b16 %v177_v50  ;;  %v466_v56 = vsel %vm1032_vm6, %v433_v48, 0  ;;  %v134_v1 = vshll.u32 %v105_v45, 16 }
  0x20   :  { %v198_v58 = vunpack.c.l.b16 %v178_v54  ;;  %v467_v59 = vsel %vm1032_vm6, %v436_v51, 0  ;;  %v486_v60 = vunpack.c.l.b16 %v466_v56  ;;  %v264_v3 = vpack.c.b16 %v1017_v22, %v1015_v18 }
  0x21   :  { %v487_v62 = vunpack.c.l.b16 %v467_v59  ;;  %v437_v4 = vrot.slane %v125_v57, 1  ;;  %v129_v7 = vrot.slane %v127_v63, 1  ;;  %v136_v8 = vrot.slane %v134_v1, 1 }
  0x22   :  { %v205_v2 = vpack.c.b16 %v198_v58, %v197_v55  ;;  %v438_v9 = vrot.slane %v127_v63, 2  ;;  %v335_v10 = vsel %vm328_vm1, %v322_v52, 0  ;;  %v337_v11 = vsel %vm328_vm1, %v323_v61, 0 }
  0x23   :  { %v494_v6 = vpack.c.b16 %v487_v62, %v486_v60  ;;  %v440_v12 = vrot.slane %v132_v0, 1  ;;  %v441_v13 = vrot.slane %v134_v1, 2  ;;  %v130_v14 = vor.u32 %v129_v7, %v125_v57 }
  0x24   :  { %778 = vmatmul.msk.bf16.vlgmr.msra.gmra.mxu0 %vm221_vm0, %v205_v2  ;;  %v137_v15 = vor.u32 %v136_v8, %v132_v0  ;;  %v439_v17 = vor.u32 %v438_v9, %v437_v4  ;;  %v360_v19 = vunpack.c.l.b16 %v335_v10  ;;  %v361_v20 = vunpack.c.l.b16 %v337_v11 }
  0x25   :  { %814 = vmatmul.msk.bf16.vlgmr.msra.gmra.mxu3 %vm221_vm0, %v494_v6  ;;  %v442_v18 = vor.u32 %v441_v13, %v440_v12  ;;  %v106_v21 = vpack.c.b16 %v1049_v5, %v1049_v5  ;;  %v179_v22 = vsel %vm1026_vm5, %v130_v14, 0  ;;  %v107_v24 = vpack.c.b16 %v99_v16, %v99_v16 }
  0x26   :  { %v180_v23 = vsel %vm1026_vm5, %v137_v15, 0  ;;  %v468_v25 = vsel %vm1032_vm6, %v439_v17, 0  ;;  %v367_v27 = vpack.c.b16 %v361_v20, %v360_v19  ;;  %v199_v28 = vunpack.c.l.b16 %v179_v22 }
  0x27   :  { %v469_v26 = vsel %vm1032_vm6, %v442_v18, 0  ;;  %v200_v29 = vunpack.c.l.b16 %v180_v23  ;;  %v141_v30 = vshll.u32 %v106_v21, 16  ;;  %v488_v31 = vunpack.c.l.b16 %v468_v25 }
  0x28   :  { %791 = vmatmul.msk.bf16.gmra.mxu1 %vm221_vm0, %v264_v3  ;;  %v489_v32 = vunpack.c.l.b16 %v469_v26  ;;  %v148_v33 = vshll.u32 %v107_v24, 16  ;;  %v139_v34 = vshrl.u32 %v106_v21, 16  ;;  %v146_v35 = vshrl.u32 %v107_v24, 16 }
  0x29   :  { %v206_v39 = vpack.c.b16 %v200_v29, %v199_v28  ;;  %v324_v40 = vrot.slane %v106_v21, 1  ;;  %v325_v41 = vrot.slane %v107_v24, 1  ;;  %v143_v42 = vrot.slane %v141_v30, 1 }
  0x2a   :  { %v495_v43 = vpack.c.b16 %v489_v32, %v488_v31  ;;  %v150_v45 = vrot.slane %v148_v33, 1  ;;  %v77_v46 = vpack.c.bf16 %v69_v36, %v69_v36  ;;  %v78_v47 = vpack.c.bf16 %v70_v37, %v70_v37 }
  0x2b   :  { %v443_v48 = vrot.slane %v139_v34, 1  ;;  %v444_v49 = vrot.slane %v141_v30, 2  ;;  %v446_v50 = vrot.slane %v146_v35, 1  ;;  %v447_v51 = vrot.slane %v148_v33, 2 }
  0x2c   :  { %v265_v52 = vpack.c.b16 %v99_v16, %v1049_v5  ;;  %v339_v53 = vsel %vm328_vm1, %v324_v40, 0  ;;  %v341_v54 = vsel %vm328_vm1, %v325_v41, 0  ;;  %v144_v55 = vor.u32 %v143_v42, %v139_v34 }
  0x2d   :  { %v151_v56 = vor.u32 %v150_v45, %v146_v35  ;;  %v100_v57 = vunpack.c.l.b16 %v77_v46  ;;  %v101_v58 = vunpack.c.l.b16 %v78_v47  ;;  %v445_v59 = vor.u32 %v444_v49, %v443_v48 }
  0x2e   :  { %v448_v60 = vor.u32 %v447_v51, %v446_v50  ;;  %v362_v61 = vunpack.c.l.b16 %v339_v53  ;;  %v363_v62 = vunpack.c.l.b16 %v341_v54  ;;  %v181_v63 = vsel %vm1026_vm5, %v144_v55, 0 }
  0x2f   :  { %803 = vmatmul.msk.bf16.gmra.mxu2 %vm221_vm0, %v367_v27  ;;  %v182_v0 = vsel %vm1026_vm5, %v151_v56, 0  ;;  %v108_v1 = vpack.c.b16 %v100_v57, %v100_v57  ;;  %v109_v2 = vpack.c.b16 %v101_v58, %v101_v58  ;;  %v470_v3 = vsel %vm1032_vm6, %v445_v59, 0 }
  0x30   :  { %v471_v4 = vsel %vm1032_vm6, %v448_v60, 0  ;;  %v368_v5 = vpack.c.b16 %v363_v62, %v362_v61  ;;  %v201_v6 = vunpack.c.l.b16 %v181_v63  ;;  %v202_v7 = vunpack.c.l.b16 %v182_v0 }
  0x31   :  { %v490_v8 = vunpack.c.l.b16 %v470_v3  ;;  %v491_v9 = vunpack.c.l.b16 %v471_v4  ;;  %v155_v10 = vshll.u32 %v108_v1, 16  ;;  %v162_v11 = vshll.u32 %v109_v2, 16 }
  0x32   :  { %v153_v12 = vshrl.u32 %v108_v1, 16  ;;  %v160_v13 = vshrl.u32 %v109_v2, 16  ;;  %v207_v14 = vpack.c.b16 %v202_v7, %v201_v6  ;;  %v326_v15 = vrot.slane %v108_v1, 1 }
  0x33   :  { %v327_v16 = vrot.slane %v109_v2, 1  ;;  %v496_v17 = vpack.c.b16 %v491_v9, %v490_v8  ;;  %v157_v18 = vrot.slane %v155_v10, 1  ;;  %v164_v19 = vrot.slane %v162_v11, 1  ;;  %v863_v2 = vld [vmem:[#allocation5 + $0x68] sm:$0xff] }
  0x34   :  { %779 = vmatmul.msk.bf16.gmra.mxu0 %vm221_vm0, %v206_v39  ;;  %v449_v20 = vrot.slane %v153_v12, 1  ;;  %v450_v21 = vrot.slane %v155_v10, 2  ;;  %v452_v22 = vrot.slane %v160_v13, 1  ;;  %v453_v23 = vrot.slane %v162_v11, 2 }
  0x35   :  { %815 = vmatmul.msk.bf16.gmra.mxu3 %vm221_vm0, %v495_v43  ;;  %v266_v24 = vpack.c.b16 %v101_v58, %v100_v57  ;;  %v343_v25 = vsel %vm328_vm1, %v326_v15, 0  ;;  %v345_v26 = vsel %vm328_vm1, %v327_v16, 0  ;;  %v158_v27 = vor.u32 %v157_v18, %v153_v12  ;;  %v864_v57 = vld [vmem:[#allocation5 + $0x70] sm:$0xff] }
  0x36   :  { %v165_v28 = vor.u32 %v164_v19, %v160_v13  ;;  %v451_v29 = vor.u32 %v450_v21, %v449_v20  ;;  %v454_v30 = vor.u32 %v453_v23, %v452_v22  ;;  %v364_v31 = vunpack.c.l.b16 %v343_v25  ;;  %v862_v19 = vld [vmem:[#allocation5 + $0x60] sm:$0xff] }
  0x37   :  { %v365_v32 = vunpack.c.l.b16 %v345_v26  ;;  %v183_v33 = vsel %vm1026_vm5, %v158_v27, 0 }
  0x38   :  { %792 = vmatmul.msk.bf16.gmra.mxu1 %vm221_vm0, %v265_v52  ;;  %v184_v34 = vsel %vm1026_vm5, %v165_v28, 0  ;;  %v472_v35 = vsel %vm1032_vm6, %v451_v29, 0  ;;  %v473_v36 = vsel %vm1032_vm6, %v454_v30, 0  ;;  %v203_v39 = vunpack.c.l.b16 %v183_v33  ;;  %v865_v52 = vld [vmem:[#allocation5 + $0x78] sm:$0xff] }
  0x39   :  { %v369_v37 = vpack.c.b16 %v365_v32, %v364_v31  ;;  %v204_v40 = vunpack.c.l.b16 %v184_v34  ;;  %v492_v41 = vunpack.c.l.b16 %v472_v35  ;;  %v493_v42 = vunpack.c.l.b16 %v473_v36  ;;  %737 = vmatpush.bf16.msrb.mxu0 %v865_v52  ;;  %v861_v30 = vld [vmem:[#allocation5 + $0x58] sm:$0xff]  ;;  %v1105_v34 = vld [vmem:[#allocation7 + $0x10] sm:$0xff] }
  0x3b   :  { %v208_v43 = vpack.c.b16 %v204_v40, %v203_v39  ;;  %v497_v45 = vpack.c.b16 %v493_v42, %v492_v41  ;;  %v860_v39 = vld [vmem:[#allocation5 + $0x50] sm:$0xff] }
  0x3d   :  { %738 = vmatpush.bf16.msrb.mxu0 %v864_v57  ;;  %v858_v57 = vld [vmem:[#allocation5 + $0x40] sm:$0xff] }
  0x3f   :  { %804 = vmatmul.msk.bf16.gmra.mxu2 %vm221_vm0, %v368_v5 }
  0x41   :  { %739 = vmatpush.bf16.msrb.mxu0 %v863_v2 }
  0x44   :  { %780 = vmatmul.msk.bf16.gmra.mxu0 %vm221_vm0, %v207_v14  ;;  %v1098_v14 = vld [vmem:[#allocation7] ss:$0 sm:$0xff] }
  0x45   :  { %816 = vmatmul.msk.bf16.gmra.mxu3 %vm221_vm0, %v496_v17  ;;  %740 = vmatpush.bf16.msrb.mxu0 %v862_v19 }
  0x48   :  { %793 = vmatmul.msk.bf16.gmra.mxu1 %vm221_vm0, %v266_v24 }
  0x49   :  { %741 = vmatpush.bf16.msrb.mxu0 %v861_v30 }
  0x4d   :  { %742 = vmatpush.bf16.msrb.mxu0 %v860_v39 }
  0x4f   :  { %805 = vmatmul.msk.bf16.gmra.mxu2 %vm221_vm0, %v369_v37 }
  0x54   :  { %781 = vmatmul.msk.bf16.gmra.mxu0 %vm221_vm0, %v208_v43 }
  0x55   :  { %817 = vmatmul.msk.bf16.gmra.mxu3 %vm221_vm0, %v497_v45 }
  0x95   :  { %v300_v38 = vpop.f32.mrf.mxu1 }
  0x9d   :  { %v302_v46 = vpop.f32.mrf.mxu1 }
  0xa1   :  { %v243_v47 = vpop.f32.mrf.mxu0 }
  0xa2   :  { %v403_v48 = vpop.f32.mrf.mxu2  ;;  %v301_v63 = vadd.f32 %v300_v38, %v243_v47  ;;  %v859_v47 = vld [vmem:[#allocation5 + $0x48] sm:$0xff] }
  0xa3   :  { %743 = vmatpush.bf16.msrb.mxu0 %v859_v47 }
  0xa4   :  { %v423_v5 = vadd.f32 %v403_v48, %v301_v63 }
  0xa5   :  { %v305_v44 = vpop.f32.mrf.mxu1 }
  0xa7   :  { %744 = vmatpush.bf16.msrb.mxu0 %v858_v57 }
  0xa8   :  { %v531_v49 = vpop.f32.mrf.mxu3 }
  0xa9   :  { %v245_v50 = vpop.f32.mrf.mxu0  ;;  %v551_v13 = vadd.f32 %v531_v49, %v423_v5 }
  0xaa   :  { %v405_v51 = vpop.f32.mrf.mxu2  ;;  %v303_v0 = vadd.f32 %v302_v46, %v245_v50 }
  0xab   :  { %v560_v22 = vadd.f32 %v1098_v14, %v551_v13 }
  0xac   :  { %v424_v6 = vadd.f32 %v405_v51, %v303_v0 }
  0xad   :  { %v307_v55 = vpop.f32.mrf.mxu1  ;;  %v568_v32 = vmax.f32 %v560_v22, 0.0 }
  0xaf   :  { %v576_v43 = vmul.f32 %v568_v32, %v1105_v34 }
  0xb0   :  { %v533_v53 = vpop.f32.mrf.mxu3 }
  0xb1   :  { %v248_v54 = vpop.f32.mrf.mxu0  ;;  %v552_v10 = vadd.f32 %v533_v53, %v424_v6  ;;  %v584_v53 = vrot.slane %v576_v43, 4 }
  0xb2   :  { %v408_v56 = vpop.f32.mrf.mxu2  ;;  %v306_v61 = vadd.f32 %v305_v44, %v248_v54 }
  0xb3   :  { %v561_v18 = vadd.f32 %v1098_v14, %v552_v10  ;;  %v585_v63 = vmax.f32 %v576_v43, %v584_v53 }
  0xb4   :  { %v425_v3 = vadd.f32 %v408_v56, %v306_v61 }
  0xb5   :  { %v310_v62 = vpop.f32.mrf.mxu1  ;;  %v569_v27 = vmax.f32 %v561_v18, 0.0 }
  0xb7   :  { %v577_v36 = vmul.f32 %v569_v27, %v1105_v34 }
  0xb8   :  { %v536_v58 = vpop.f32.mrf.mxu3 }
  0xb9   :  { %v250_v59 = vpop.f32.mrf.mxu0  ;;  %v553_v12 = vadd.f32 %v536_v58, %v425_v3  ;;  %v590_v50 = vrot.slane %v577_v36, 4 }
  0xba   :  { %v410_v60 = vpop.f32.mrf.mxu2  ;;  %v308_v1 = vadd.f32 %v307_v55, %v250_v59 }
  0xbb   :  { %v562_v20 = vadd.f32 %v1098_v14, %v553_v12  ;;  %v591_v59 = vmax.f32 %v577_v36, %v590_v50  ;;  %v586_v12 = vrot.slane %v585_v63, 2 }
  0xbc   :  { %v426_v11 = vadd.f32 %v410_v60, %v308_v1 }
  0xbd   :  { %v312_v17 = vpop.f32.mrf.mxu1  ;;  %v570_v31 = vmax.f32 %v562_v20, 0.0  ;;  %v592_v6 = vrot.slane %v591_v59, 2 }
  0xbf   :  { %v578_v40 = vmul.f32 %v570_v31, %v1105_v34 }
  0xc0   :  { %v538_v4 = vpop.f32.mrf.mxu3 }
  0xc1   :  { %v253_v7 = vpop.f32.mrf.mxu0  ;;  %v554_v15 = vadd.f32 %v538_v4, %v426_v11  ;;  %v596_v52 = vrot.slane %v578_v40, 4 }
  0xc2   :  { %v311_v8 = vadd.f32 %v310_v62, %v253_v7  ;;  %v413_v9 = vpop.f32.mrf.mxu2 }
  0xc3   :  { %v563_v23 = vadd.f32 %v1098_v14, %v554_v15  ;;  %v597_v61 = vmax.f32 %v578_v40, %v596_v52 }
  0xc4   :  { %v427_v16 = vadd.f32 %v413_v9, %v311_v8 }
  0xc5   :  { %v571_v33 = vmax.f32 %v563_v23, 0.0  ;;  %v315_v41 = vpop.f32.mrf.mxu1  ;;  %v598_v10 = vrot.slane %v597_v61, 2  ;;  %v587_v23 = vmax.f32 %v585_v63, %v586_v12 }
  0xc7   :  { %v579_v45 = vmul.f32 %v571_v33, %v1105_v34  ;;  %v588_v33 = vrot.slane %v587_v23, 1 }
  0xc8   :  { %v541_v21 = vpop.f32.mrf.mxu3 }
  0xc9   :  { %v555_v24 = vadd.f32 %v541_v21, %v427_v16  ;;  %v255_v25 = vpop.f32.mrf.mxu0  ;;  %v602_v54 = vrot.slane %v579_v45, 4  ;;  %v599_v21 = vmax.f32 %v597_v61, %v598_v10 }
  0xca   :  { %v415_v26 = vpop.f32.mrf.mxu2  ;;  %v313_v29 = vadd.f32 %v312_v17, %v255_v25  ;;  %v593_v17 = vmax.f32 %v591_v59, %v592_v6 }
  0xcb   :  { %v564_v28 = vadd.f32 %v1098_v14, %v555_v24  ;;  %v603_v0 = vmax.f32 %v579_v45, %v602_v54  ;;  %v600_v32 = vrot.slane %v599_v21, 1 }
  0xcc   :  { %v428_v37 = vadd.f32 %v415_v26, %v313_v29 }
  0xcd   :  { %v572_v35 = vmax.f32 %v564_v28, 0.0  ;;  %v317_v5 = vpop.f32.mrf.mxu1  ;;  %v604_v13 = vrot.slane %v603_v0, 2  ;;  %v594_v28 = vrot.slane %v593_v17, 1  ;;  %v601_v45 = vmax.f32 %v599_v21, %v600_v32 }
  0xcf   :  { %v580_v48 = vmul.f32 %v572_v35, %v1105_v34  ;;  %v605_v24 = vmax.f32 %v603_v0, %v604_v13  ;;  %v595_v40 = vmax.f32 %v593_v17, %v594_v28 }
  0xd0   :  { %v543_v42 = vpop.f32.mrf.mxu3 }
  0xd1   :  { %v556_v38 = vadd.f32 %v543_v42, %v428_v37  ;;  %v258_v46 = vpop.f32.mrf.mxu0  ;;  %v608_v58 = vrot.slane %v580_v48, 4  ;;  %v606_v35 = vrot.slane %v605_v24, 1 }
  0xd2   :  { %v316_v49 = vadd.f32 %v315_v41, %v258_v46  ;;  %v418_v44 = vpop.f32.mrf.mxu2 }
  0xd3   :  { %v565_v51 = vadd.f32 %v1098_v14, %v556_v38  ;;  %v609_v4 = vmax.f32 %v580_v48, %v608_v58  ;;  %v589_v38 = vmax.f32 %v587_v23, %v588_v33  ;;  %v607_v46 = vmax.f32 %v605_v24, %v606_v35 }
  0xd4   :  { %v429_v56 = vadd.f32 %v418_v44, %v316_v49  ;;  %v649_v44 = vpack.c.bf16 %v595_v40, %v595_v40 }
  0xd5   :  { %v573_v55 = vmax.f32 %v565_v51, 0.0  ;;  %v610_v16 = vrot.slane %v609_v4, 2  ;;  %v650_v51 = vpack.c.bf16 %v601_v45, %v601_v45  ;;  %v648_v53 = vpack.c.bf16 %v589_v38, %v589_v38 }
  0xd6   :  { %v651_v54 = vpack.c.bf16 %v607_v46, %v607_v46  ;;  %v666_v57 = vunpack.c.l.b16 %v649_v44 }
  0xd7   :  { %v581_v60 = vmul.f32 %v573_v55, %v1105_v34  ;;  %v611_v27 = vmax.f32 %v609_v4, %v610_v16  ;;  %v665_v61 = vunpack.c.l.b16 %v648_v53 }
  0xd8   :  { %v546_v62 = vpop.f32.mrf.mxu3 }
  0xd9   :  { %v614_v1 = vrot.slane %v581_v60, 4  ;;  %v557_v2 = vadd.f32 %v546_v62, %v429_v56  ;;  %v260_v3 = vpop.f32.mrf.mxu0  ;;  %v612_v39 = vrot.slane %v611_v27, 1  ;;  %v668_v62 = vunpack.c.l.b16 %v651_v54 }
  0xda   :  { %v318_v9 = vadd.f32 %v317_v5, %v260_v3  ;;  %v420_v11 = vpop.f32.mrf.mxu2 }
  0xdb   :  { %v615_v7 = vmax.f32 %v581_v60, %v614_v1  ;;  %v566_v8 = vadd.f32 %v1098_v14, %v557_v2  ;;  %v613_v49 = vmax.f32 %v611_v27, %v612_v39  ;;  %v674_v1 = vsel %vm673_vm7, %v666_v57, %v665_v61 }
  0xdc   :  { %v430_v20 = vadd.f32 %v420_v11, %v318_v9 }
  0xdd   :  { %v574_v15 = vmax.f32 %v566_v8, 0.0  ;;  %v616_v18 = vrot.slane %v615_v7, 2  ;;  %v652_v56 = vpack.c.bf16 %v613_v49, %v613_v49 }
  0xdf   :  { %v582_v19 = vmul.f32 %v574_v15, %v1105_v34  ;;  %v617_v29 = vmax.f32 %v615_v7, %v616_v18  ;;  %v669_v0 = vunpack.c.l.b16 %v652_v56  ;;  %v875_v15 = vld [vmem:[#allocation7 + $0x8] ss:$0 sm:$0xff] }
  0xe0   :  { %v548_v22 = vpop.f32.mrf.mxu3 }
  0xe1   :  { %v620_v25 = vrot.slane %v582_v19, 4  ;;  %v558_v26 = vadd.f32 %v548_v22, %v430_v20  ;;  %v618_v41 = vrot.slane %v617_v29, 1 }
  0xe3   :  { %v621_v30 = vmax.f32 %v582_v19, %v620_v25  ;;  %v567_v31 = vadd.f32 %v1098_v14, %v558_v26  ;;  %v619_v50 = vmax.f32 %v617_v29, %v618_v41 }
  0xe5   :  { %v622_v36 = vrot.slane %v621_v30, 2  ;;  %v575_v37 = vmax.f32 %v567_v31, 0.0  ;;  %v653_v58 = vpack.c.bf16 %v619_v50, %v619_v50 }
  0xe7   :  { %v623_v42 = vmax.f32 %v621_v30, %v622_v36  ;;  %v583_v43 = vmul.f32 %v575_v37, %v1105_v34  ;;  %v667_v34 = vunpack.c.l.b16 %v650_v51  ;;  %v670_v2 = vunpack.c.l.b16 %v653_v58 }
  0xe9   :  { %v624_v47 = vrot.slane %v623_v42, 1  ;;  %v626_v48 = vrot.slane %v583_v43, 4  ;;  %v676_v5 = vsel %vm675_vm8, %v667_v34, %v674_v1 }
  0xea   :  { %v678_v7 = vsel %vm677_vm9, %v668_v62, %v676_v5 }
  0xeb   :  { %v627_v14 = vmax.f32 %v583_v43, %v626_v48  ;;  %v625_v52 = vmax.f32 %v623_v42, %v624_v47  ;;  %v680_v8 = vsel %vm679_vm10, %v669_v0, %v678_v7 }
  0xec   :  { %v682_v10 = vsel %vm681_vm11, %v670_v2, %v680_v8 }
  0xed   :  { %v628_v55 = vrot.slane %v627_v14, 2  ;;  %v654_v60 = vpack.c.bf16 %v625_v52, %v625_v52 }
  0xef   :  { %v629_v59 = vmax.f32 %v627_v14, %v628_v55  ;;  %v671_v4 = vunpack.c.l.b16 %v654_v60 }
  0xf1   :  { %v630_v63 = vrot.slane %v629_v59, 1  ;;  %v684_v11 = vsel %vm683_vm12, %v671_v4, %v682_v10 }
  0xf3   :  { %v631_v3 = vmax.f32 %v629_v59, %v630_v63 }
  0xf5   :  { %v655_v6 = vpack.c.bf16 %v631_v3, %v631_v3 }
  0xf7   :  { %v672_v9 = vunpack.c.l.b16 %v655_v6 }
  0xf9   :  { %v686_v12 = vsel %vm685_vm13, %v672_v9, %v684_v11 }
  0xfa   :  { %v687_v13 = vpack.c.b16 %v686_v12, %v686_v12 }
  0xfc   :  { %745 = vmatmul.bf16.vlgmr.msrb.gmra.mxu0 %v687_v13 }
 0x179   :  { %v746_v16 = vpop.f32.mrf.mxu0 }
 0x17a   :  { %v747_v17 = vadd.f32 %v875_v15, %v746_v16 }
 0x17c   :  { %v750_v18 = vpack.c.bf16 %v747_v17, %v747_v17 }
 0x17e   :  { %751 = vst [vmem:[#allocation8] sm:$0xf] %v750_v18 }
 0x17f   :  { %762 = dma.vmem_to_hbm [thread:$0]  %s758_s2, 64, %s760_s5, [#allocation4]  }
 0x181   :  { %v748_v19 = vpop.f32.mrf.mxu0 }
 0x182   :  { %976 = dma.done.wait [#allocation4], 64  }
 0x183   :  { %977 = vsyncadd [#allocation4], 4294967232 }
 0x184   :  { %767 = vsyncpa [#allocation3], 1 }
 0x185   :  { %768 = vsyncpa [#allocation6], 1 }
 0x186   :  { %769 = vsyncpa [#allocation4], 1 }

</bundles_post_ra>
